<compile_context>
chip_gen: v6e
topology: v6e:2x2x1
jax: 0.10.0
libtpu: 0.0.40
codegen_flags: <defaults>
</compile_context>

<pallas_src>
import jax
import jax.numpy as jnp
from jax.experimental import pallas as pl
from jax.experimental.pallas import tpu as pltpu

TRUNC_NORM_INIT_STD = 1e-4  # config.trunc_norm_init_std


def _reduce_state_kernel(x_ref, w_ref, b_ref, o_ref):
    # x_ref: (B, 8H) lane-dense packed states; w_ref: (8H, 4H) block-diagonal
    # weight; b_ref: (1, 4H) concatenated bias; o_ref: (B, 4H).
    y = jnp.dot(x_ref[...], w_ref[...],
                preferred_element_type=jnp.float32) + b_ref[...]
    o_ref[...] = jnp.maximum(y, 0.0).astype(o_ref.dtype)


def _flatten(x):
    # x: (2, B, H) -> transpose(0,1).contiguous().view(B, 2H)
    two, B, H = x.shape
    return jnp.transpose(x, (1, 0, 2)).reshape(B, two * H)


@jax.jit
def _reduce_state_forward(h, c, h2, c2, w_bd, b_cat):
    """h/c/h2/c2: (2, B, H); w_bd: (8H, 4H); b_cat: (1, 4H).

    Returns four (1, B, H) arrays:
        (reduced_h, reduced_c, sent_reduced_h, sent_reduced_c)
    """
    B, H = h.shape[1], h.shape[2]
    four_h = 4 * H

    # Lane-dense (B, 8H) operand: row b is [h[0,b],h[1,b],c[0,b],c[1,b],...],
    # i.e. transpose(0,1).view(B, 2H) per state, concatenated over the 4
    # states — matching the block-diagonal weight layout.
    x = jnp.concatenate(
        [_flatten(h), _flatten(c), _flatten(h2), _flatten(c2)], axis=-1)

    itemsize = jnp.dtype(h.dtype).itemsize
    cost = pl.CostEstimate(
        flops=2 * B * (8 * H) * four_h,
        transcendentals=0,
        bytes_accessed=(x.size + w_bd.size + b_cat.size + B * four_h)
        * itemsize,
    )

    vmem_spec = pl.BlockSpec(memory_space=pltpu.MemorySpace.VMEM)
    out = pl.pallas_call(
        _reduce_state_kernel,
        out_shape=jax.ShapeDtypeStruct((B, four_h), h.dtype),
        in_specs=[vmem_spec, vmem_spec, vmem_spec],
        out_specs=vmem_spec,
        cost_estimate=cost,
    )(x, w_bd, b_cat)

    # Per-state slices + unsqueeze(0) fuse into the same program under jit.
    reduced_h = out[:, 0 * H:1 * H][None]       # (1, B, H)
    reduced_c = out[:, 1 * H:2 * H][None]
    sent_reduced_h = out[:, 2 * H:3 * H][None]
    sent_reduced_c = out[:, 3 * H:4 * H][None]
    return reduced_h, reduced_c, sent_reduced_h, sent_reduced_c


class ReduceState:
    """JAX/Pallas port of training_ptr_gen.model.ReduceState (hierarchical)."""

    def __init__(self, hidden_dim, key):
        self.hidden_dim = hidden_dim
        H = hidden_dim
        ks = jax.random.split(key, 8)
        std = TRUNC_NORM_INIT_STD

        def lin(kw, kb):
            # PyTorch Linear stores weight as (out, in); keep that convention.
            w = std * jax.random.normal(kw, (H, 2 * H), jnp.float32)
            b = std * jax.random.normal(kb, (H,), jnp.float32)
            return w, b

        self.reduce_h_w, self.reduce_h_b = lin(ks[0], ks[1])
        self.reduce_c_w, self.reduce_c_b = lin(ks[2], ks[3])
        self.sent_reduce_h_w, self.sent_reduce_h_b = lin(ks[4], ks[5])
        self.sent_reduce_c_w, self.sent_reduce_c_b = lin(ks[6], ks[7])

        # Pre-pack the block-diagonal weight (8H, 4H) and concatenated bias
        # ONCE at init (weights are static). block_diag replaces the old
        # loop of .at[...].set() calls.
        self.w_bd = jax.device_put(
            jax.scipy.linalg.block_diag(
                self.reduce_h_w.T, self.reduce_c_w.T,
                self.sent_reduce_h_w.T, self.sent_reduce_c_w.T))
        self.b_cat = jax.device_put(
            jnp.concatenate(
                [self.reduce_h_b, self.reduce_c_b,
                 self.sent_reduce_h_b, self.sent_reduce_c_b],
                axis=0).reshape(1, 4 * H))

    def __call__(self, hidden, sent_hidden):
        h, c = hidden
        h2, c2 = sent_hidden
        rh, rc, srh, src = _reduce_state_forward(
            h, c, h2, c2, self.w_bd, self.b_cat)
        return (rh, rc), (srh, src)


def _reference(model, hidden, sent_hidden):
    def one(x, w, b):
        x_in = _flatten(x)
        return jnp.maximum(x_in @ w.T + b, 0.0)[None]

    h, c = hidden
    h2, c2 = sent_hidden
    return ((one(h, model.reduce_h_w, model.reduce_h_b),
             one(c, model.reduce_c_w, model.reduce_c_b)),
            (one(h2, model.sent_reduce_h_w, model.sent_reduce_h_b),
             one(c2, model.sent_reduce_c_w, model.sent_reduce_c_b)))


if __name__ == "__main__":
    hidden_dim = 32
    batch = 2

    key = jax.random.PRNGKey(0)
    k_model, k_h, k_c, k_h2, k_c2 = jax.random.split(key, 5)

    model = ReduceState(hidden_dim, k_model)

    # bidirectional-LSTM-style states: (num_directions=2, batch, hidden_dim)
    h = jax.random.normal(k_h, (2, batch, hidden_dim), jnp.float32)
    c = jax.random.normal(k_c, (2, batch, hidden_dim), jnp.float32)
    h2 = jax.random.normal(k_h2, (2, batch, hidden_dim), jnp.float32)
    c2 = jax.random.normal(k_c2, (2, batch, hidden_dim), jnp.float32)

    out = model((h, c), (h2, c2))
    out = jax.block_until_ready(out)

    ref = _reference(model, (h, c), (h2, c2))
    for o_pair, r_pair in zip(out, ref):
        for o, r in zip(o_pair, r_pair):
            assert o.shape == (1, batch, hidden_dim), o.shape
            assert jnp.allclose(o, r, atol=1e-5, rtol=1e-5)

    print("KERNEL_OK")
</pallas_src>

<mosaic_0001>
module attributes {stable_mosaic.version = 11 : i64} {
  func.func @_reduce_state_kernel(%arg0: memref<2x256xf32, #tpu.memory_space<vmem>>, %arg1: memref<256x128xf32, #tpu.memory_space<vmem>>, %arg2: memref<1x128xf32, #tpu.memory_space<vmem>>, %arg3: memref<2x128xf32, #tpu.memory_space<vmem>>) attributes {dimension_semantics = [], scalar_prefetch = 0 : i64, scratch_operands = 0 : i64, tpu.core_type = #tpu.core_type<tc>} {
    %c0 = arith.constant 0 : index
    %c0_0 = arith.constant 0 : index
    %0 = vector.load %arg0[%c0, %c0_0] : memref<2x256xf32, #tpu.memory_space<vmem>>, vector<2x256xf32>
    %c0_1 = arith.constant 0 : index
    %c0_2 = arith.constant 0 : index
    %1 = vector.load %arg1[%c0_1, %c0_2] : memref<256x128xf32, #tpu.memory_space<vmem>>, vector<256x128xf32>
    %cst = arith.constant dense<0.000000e+00> : vector<2x128xf32>
    %2 = tpu.matmul %0, %1, %cst {dimension_numbers = #tpu.dot_dimension_numbers<[1], [0], [0], [1], [0, 0, 1, 1], [], []>} : vector<2x256xf32>, vector<256x128xf32>, vector<2x128xf32> -> vector<2x128xf32>
    %c0_3 = arith.constant 0 : index
    %c0_4 = arith.constant 0 : index
    %3 = vector.load %arg2[%c0_3, %c0_4] : memref<1x128xf32, #tpu.memory_space<vmem>>, vector<1x128xf32>
    %4 = vector.broadcast %3 : vector<1x128xf32> to vector<2x128xf32>
    %5 = arith.addf %2, %4 : vector<2x128xf32>
    %cst_5 = arith.constant 0.000000e+00 : f32
    %6 = vector.broadcast %cst_5 : f32 to vector<2x128xf32>
    %7 = arith.maximumf %5, %6 : vector<2x128xf32>
    %c0_6 = arith.constant 0 : index
    %c0_7 = arith.constant 0 : index
    %8 = vector.load %arg3[%c0_6, %c0_7] : memref<2x128xf32, #tpu.memory_space<vmem>>, vector<2x128xf32>
    tpu.vector_store %arg3[%c0_6, %c0_7], %7 {strides = array<i32>} : memref<2x128xf32, #tpu.memory_space<vmem>>, vector<2x128xf32>,
    return
  }
}

</mosaic_0001>

<bundles_post_ra>
// kernel: _reduce_state_forward.1
= control target key start
LH: loop header
LB: loop body
LE: loop exit
PB: predicated region body
PF: predicated region fallthrough
CT: control target
= control target key end

     0   :  { %8 = vsyncpa [#allocation3], 0  ;;  %s218_s12 = smov [#allocation2]   ;;  %s253_s0 = inlined_call_operand.vmem [shape: f32[2,256], index: 0, kind: input, shape index: {}]   ;;  %s254_s1 = inlined_call_operand.hbm [shape: f32[256,128], index: 1, kind: input, shape index: {}]   ;;  %s255_s2 = inlined_call_operand.vmem [shape: f32[1,128], index: 2, kind: input, shape index: {}]   ;;  %s256_s3 = inlined_call_operand.vmem [shape: f32[2,128], index: 3, kind: output, shape index: {}]  }
   0x1   :  { %s16_s13 = sshll.u32 %s218_s12, 4  ;;  %s17_s13 = int_to_ptr.vmem [resolvable:$true] %s16_s13 }
   0x2   :  { %s204_s14 = scalar_lea.vmem %s17_s13, 4096  ;;  %p209_p1 = scmp.lt.s32.totalorder %s17_s13, %s17_s13 }
   0x3   :  { %p205_p0 = scmp.ne.s32.totalorder %s17_s13, %s204_s14  ;;  %p210_p2 = scmp.lt.s32.totalorder %s204_s14, %s204_s14 }
   0x5   :  { %p211_p3 = por %p210_p2, %p209_p1 }
   0x7   :  { %p212_p4 = pnand %p211_p3, %p205_p0 }
   0x9   :  { %215 = shalt.err (!%p212_p4)
}
   0xa   :  { %s219_s15 = smov 128   ;;  %s220_s16 = smov 8  }
   0xb   :  { %22 = dma.hbm_to_vmem [thread:$0]  %s254_s1, 4096, %s17_s13, [#allocation3], %s219_s15, %s219_s15, %s220_s16  }
   0xc   :  { %216 = dma.done.wait [#allocation3], 4096  }
   0xd   :  { %217 = vsyncadd [#allocation3], 4294963200  ;;  %v60_v0 = vld [vmem:[#allocation2 + $0xf8] sm:$0xff]  ;;  %v59_v2 = vld [vmem:[#allocation2 + $0xf0] sm:$0xff] }
   0xe   :  { %v44_v1 = vld [vmem:[#allocation2 + $0x78] sm:$0xff]  ;;  %158 = vmatprep.subr.mxu0 %v60_v0  ;;  %v43_v3 = vld [vmem:[#allocation2 + $0x70] sm:$0xff]  ;;  %v58_v4 = vld [vmem:[#allocation2 + $0xe8] sm:$0xff] }
   0xf   :  { %159 = vmatpush3.msra.mxu0 %v44_v1  ;;  %v42_v5 = vld [vmem:[#allocation2 + $0x68] sm:$0xff]  ;;  %v57_v6 = vld [vmem:[#allocation2 + $0xe0] sm:$0xff]  ;;  %v56_v8 = vld [vmem:[#allocation2 + $0xd8] sm:$0xff] }
  0x10   :  { %160 = vmatprep.subr.mxu0 %v59_v2  ;;  %v41_v7 = vld [vmem:[#allocation2 + $0x60] sm:$0xff]  ;;  %v40_v9 = vld [vmem:[#allocation2 + $0x58] sm:$0xff]  ;;  %v55_v10 = vld [vmem:[#allocation2 + $0xd0] sm:$0xff] }
  0x11   :  { %161 = vmatpush3.msra.mxu0 %v43_v3  ;;  %v39_v11 = vld [vmem:[#allocation2 + $0x50] sm:$0xff]  ;;  %v54_v12 = vld [vmem:[#allocation2 + $0xc8] sm:$0xff]  ;;  %v157_v13 = vld.sshfl [vmem:[%s253_s0] sm:$0x33 pattern:$0x76325410] }
  0x12   :  { %162 = vmatprep.subr.mxu0 %v58_v4  ;;  %v38_v14 = vld [vmem:[#allocation2 + $0x48] sm:$0xff]  ;;  %v76_v15 = vcombine.high %v157_v13, %v157_v13  ;;  %v53_v16 = vld [vmem:[#allocation2 + $0xc0] sm:$0xff]  ;;  %v52_v18 = vld [vmem:[#allocation2 + $0xb8] sm:$0xff] }
  0x13   :  { %163 = vmatpush3.msra.mxu0 %v42_v5  ;;  %v37_v17 = vld [vmem:[#allocation2 + $0x40] sm:$0xff]  ;;  %v36_v19 = vld [vmem:[#allocation2 + $0x38] sm:$0xff]  ;;  %v51_v20 = vld [vmem:[#allocation2 + $0xb0] sm:$0xff] }
  0x14   :  { %164 = vmatprep.subr.mxu0 %v57_v6  ;;  %143 = vmatprep.mubr.f32.mxu0 %v76_v15  ;;  %v35_v21 = vld [vmem:[#allocation2 + $0x30] sm:$0xff]  ;;  %v50_v22 = vld [vmem:[#allocation2 + $0xa8] sm:$0xff]  ;;  %v49_v24 = vld [vmem:[#allocation2 + $0xa0] sm:$0xff] }
  0x15   :  { %165 = vmatpush3.msra.mxu0 %v41_v7  ;;  %v34_v23 = vld [vmem:[#allocation2 + $0x28] sm:$0xff]  ;;  %v33_v25 = vld [vmem:[#allocation2 + $0x20] sm:$0xff]  ;;  %v48_v26 = vld [vmem:[#allocation2 + $0x98] sm:$0xff] }
  0x16   :  { %166 = vmatprep.subr.mxu0 %v56_v8  ;;  %v32_v27 = vld [vmem:[#allocation2 + $0x18] sm:$0xff]  ;;  %v47_v28 = vld [vmem:[#allocation2 + $0x90] sm:$0xff]  ;;  %v46_v30 = vld [vmem:[#allocation2 + $0x88] sm:$0xff] }
  0x17   :  { %167 = vmatpush3.msra.mxu0 %v40_v9  ;;  %v31_v29 = vld [vmem:[#allocation2 + $0x10] sm:$0xff]  ;;  %v30_v31 = vld [vmem:[#allocation2 + $0x8] sm:$0xff]  ;;  %v45_v32 = vld [vmem:[#allocation2 + $0x80] sm:$0xff] }
  0x18   :  { %168 = vmatprep.subr.mxu0 %v55_v10  ;;  %v29_v33 = vld [vmem:[#allocation2] sm:$0xff] }
  0x19   :  { %169 = vmatpush3.msra.mxu0 %v39_v11  ;;  %v156_v35 = vld [vmem:[%s255_s2] ss:$0 sm:$0xff] }
  0x1a   :  { %170 = vmatprep.subr.mxu0 %v54_v12 }
  0x1b   :  { %171 = vmatpush3.msra.mxu0 %v38_v14 }
  0x1c   :  { %172 = vmatprep.subr.mxu0 %v53_v16 }
  0x1d   :  { %173 = vmatpush3.msra.mxu0 %v37_v17 }
  0x1e   :  { %174 = vmatprep.subr.mxu0 %v52_v18 }
  0x1f   :  { %175 = vmatpush3.msra.mxu0 %v36_v19 }
  0x20   :  { %176 = vmatprep.subr.mxu0 %v51_v20 }
  0x21   :  { %177 = vmatpush3.msra.mxu0 %v35_v21 }
  0x22   :  { %178 = vmatprep.subr.mxu0 %v50_v22 }
  0x23   :  { %179 = vmatpush3.msra.mxu0 %v34_v23 }
  0x24   :  { %180 = vmatprep.subr.mxu0 %v49_v24 }
  0x25   :  { %181 = vmatpush3.msra.mxu0 %v33_v25 }
  0x26   :  { %182 = vmatprep.subr.mxu0 %v48_v26 }
  0x27   :  { %183 = vmatpush3.msra.mxu0 %v32_v27 }
  0x28   :  { %184 = vmatprep.subr.mxu0 %v47_v28 }
  0x29   :  { %185 = vmatpush3.msra.mxu0 %v31_v29 }
  0x2a   :  { %186 = vmatprep.subr.mxu0 %v46_v30 }
  0x2b   :  { %187 = vmatpush3.msra.mxu0 %v30_v31 }
  0x2c   :  { %188 = vmatprep.subr.mxu0 %v45_v32 }
  0x2d   :  { %189 = vmatpush3.msra.mxu0 %v29_v33 }
  0x2e   :  { %144 = vmatmul.mubr.f32.vlgmr.msra.gmra.mxu0 %v157_v13 }
  0xee   :  { %v190_v34 = vpop.f32.mrf.mxu0 }
  0xf0   :  { %v191_v36 = vpop.f32.mrf.mxu0 }
  0xf1   :  { %v192_v37 = vadd.f32 %v191_v36, %v190_v34 }
  0xf3   :  { %v146_v38 = vadd.f32 %v192_v37, %v156_v35 }
  0xf5   :  { %v149_v39 = vmax.f32 %v146_v38, 0.0 }
  0xf7   :  { %150 = vst [vmem:[%s256_s3] sm:$0x3] %v149_v39 }
  0xf8   :  { %155 = vsyncpa [#allocation3], 1 }

</bundles_post_ra>
